<compile_context>
chip_gen: v7x
topology: tpu7x:2x2x1
jax: 0.10.0
libtpu: 0.0.40
codegen_flags: <defaults>
</compile_context>

<pallas_src>
import functools
import math

import jax
import jax.numpy as jnp
from jax.experimental import pallas as pl
from jax.experimental.pallas import tpu as pltpu


def _fused_mlp_kernel(*refs, num_layers, compute_dtype):
    """Entire MLP in one kernel: h = x; h = relu(h@Wi+bi) for i<last; y = h@Wn+bn.

    refs = (x_ref, w1_ref, b1_ref, ..., wn_ref, bn_ref, o_ref). Every ref is a
    whole-array VMEM block at its real (unpadded) shape; inter-layer activations
    live in vregs/VMEM and never round-trip through HBM.
    """
    x_ref = refs[0]
    o_ref = refs[-1]
    h = x_ref[...]
    for i in range(num_layers):          # static Python loop -> fully unrolled
        w_ref = refs[1 + 2 * i]
        b_ref = refs[2 + 2 * i]
        # MXU matmul with f32 accumulation. Optionally cast only the dot
        # operands (bf16 on v6e/v7x halves weight bytes); bias add / ReLU stay
        # in f32 on the accumulator (v5e has no bf16 VPU).
        a = h.astype(compute_dtype)
        w = w_ref[...].astype(compute_dtype)
        acc = jnp.dot(a, w, preferred_element_type=jnp.float32)
        acc = acc + b_ref[...].astype(jnp.float32)
        if i < num_layers - 1:           # ReLU between layers only (layers.pop())
            acc = jnp.maximum(acc, 0.0)
        h = acc
    o_ref[...] = h.astype(o_ref.dtype)


def init_mlp_params(key, dims, dtype=jnp.float32):
    """xavier_uniform_(gain=calculate_gain('relu')) weights, zero biases.

    Matches MLPLayer.__init__: weights Xavier-uniform with relu gain, biases
    zeroed. Torch Linear weight is (out, in); we store the transpose (in, out)
    so the kernel computes x @ W (the Xavier bound is symmetric, so the
    distribution is identical).
    """
    gain = math.sqrt(2.0)  # nn.init.calculate_gain('relu')
    params = []
    for in_dim, out_dim in zip(dims, dims[1:]):
        key, sub = jax.random.split(key)
        bound = gain * math.sqrt(6.0 / (in_dim + out_dim))
        w = jax.random.uniform(
            sub, (in_dim, out_dim), dtype=dtype, minval=-bound, maxval=bound
        )
        b = jnp.zeros((1, out_dim), dtype=dtype)
        params.append((w, b))
    return params


def mlp_forward(x, params, activation=None, compute_dtype=jnp.float32):
    """Matches MLPLayer.forward. `params` is a list of (W (din,dout), b (1,dout))."""
    B, d_in = x.shape
    assert d_in == params[0][0].shape[0]
    num_layers = len(params)
    d_out = params[-1][0].shape[1]

    flat = []
    for w, b in params:
        flat.extend((w, b))

    # Real (unpadded) cost: advisory only, keeps the XLA scheduler honest.
    flops = 2 * B * sum(w.shape[0] * w.shape[1] for w, _ in params)
    bytes_accessed = (
        x.size * x.dtype.itemsize
        + sum(a.size * a.dtype.itemsize for a in flat)
        + B * d_out * x.dtype.itemsize
    )

    kernel = functools.partial(
        _fused_mlp_kernel, num_layers=num_layers, compute_dtype=compute_dtype
    )
    out = pl.pallas_call(
        kernel,
        out_shape=jax.ShapeDtypeStruct((B, d_out), x.dtype),
        in_specs=[pl.BlockSpec(memory_space=pltpu.MemorySpace.VMEM)] * (1 + len(flat)),
        out_specs=pl.BlockSpec(memory_space=pltpu.MemorySpace.VMEM),
        cost_estimate=pl.CostEstimate(
            flops=flops, transcendentals=0, bytes_accessed=bytes_accessed
        ),
    )(x, *flat)

    if activation is not None:           # optional activation, like the module
        out = activation(out)
    return out


if __name__ == "__main__":
    key = jax.random.PRNGKey(0)
    dims = (32, 64, 48, 16)
    batch = 8

    k_in, k_params = jax.random.split(key)
    x = jax.random.normal(k_in, (batch, dims[0]), dtype=jnp.float32)
    params = init_mlp_params(k_params, dims)

    fwd = jax.jit(
        mlp_forward, static_argnames=("activation", "compute_dtype")
    )
    out = fwd(x, params)                 # activation=None, f32 (exact parity)
    out = jax.block_until_ready(out)

    # sanity: compare against a plain-JAX reference of the same MLP
    ref = x
    for i, (w, b) in enumerate(params):
        ref = ref @ w + b
        if i < len(params) - 1:
            ref = jnp.maximum(ref, 0.0)
    assert out.shape == (batch, dims[-1])
    assert jnp.allclose(out, ref, atol=1e-5, rtol=1e-5)

    # bf16 dot-operand path (v6e/v7x weight-DMA saver) should also run cleanly.
    out_bf16 = jax.block_until_ready(fwd(x, params, compute_dtype=jnp.bfloat16))
    assert out_bf16.shape == (batch, dims[-1])
    assert jnp.allclose(out_bf16, ref, atol=5e-2, rtol=5e-2)

    print("KERNEL_OK")
</pallas_src>

<mosaic_0001>
module attributes {stable_mosaic.version = 11 : i64} {
  func.func @_fused_mlp_kernel(%arg0: memref<8x32xf32, #tpu.memory_space<vmem>>, %arg1: memref<32x64xf32, #tpu.memory_space<vmem>>, %arg2: memref<1x64xf32, #tpu.memory_space<vmem>>, %arg3: memref<64x48xf32, #tpu.memory_space<vmem>>, %arg4: memref<1x48xf32, #tpu.memory_space<vmem>>, %arg5: memref<48x16xf32, #tpu.memory_space<vmem>>, %arg6: memref<1x16xf32, #tpu.memory_space<vmem>>, %arg7: memref<8x16xf32, #tpu.memory_space<vmem>>) attributes {dimension_semantics = [], scalar_prefetch = 0 : i64, scratch_operands = 0 : i64, tpu.core_type = #tpu.core_type<tc>} {
    %c0 = arith.constant 0 : index
    %c0_0 = arith.constant 0 : index
    %0 = vector.load %arg0[%c0, %c0_0] : memref<8x32xf32, #tpu.memory_space<vmem>>, vector<8x32xf32>
    %c0_1 = arith.constant 0 : index
    %c0_2 = arith.constant 0 : index
    %1 = vector.load %arg1[%c0_1, %c0_2] : memref<32x64xf32, #tpu.memory_space<vmem>>, vector<32x64xf32>
    %cst = arith.constant dense<0.000000e+00> : vector<8x64xf32>
    %2 = tpu.matmul %0, %1, %cst {dimension_numbers = #tpu.dot_dimension_numbers<[1], [0], [0], [1], [0, 0, 1, 1], [], []>} : vector<8x32xf32>, vector<32x64xf32>, vector<8x64xf32> -> vector<8x64xf32>
    %c0_3 = arith.constant 0 : index
    %c0_4 = arith.constant 0 : index
    %3 = vector.load %arg2[%c0_3, %c0_4] : memref<1x64xf32, #tpu.memory_space<vmem>>, vector<1x64xf32>
    %4 = vector.broadcast %3 : vector<1x64xf32> to vector<8x64xf32>
    %5 = arith.addf %2, %4 : vector<8x64xf32>
    %cst_5 = arith.constant 0.000000e+00 : f32
    %6 = vector.broadcast %cst_5 : f32 to vector<8x64xf32>
    %7 = arith.maximumf %5, %6 : vector<8x64xf32>
    %c0_6 = arith.constant 0 : index
    %c0_7 = arith.constant 0 : index
    %8 = vector.load %arg3[%c0_6, %c0_7] : memref<64x48xf32, #tpu.memory_space<vmem>>, vector<64x48xf32>
    %cst_8 = arith.constant dense<0.000000e+00> : vector<8x48xf32>
    %9 = tpu.matmul %7, %8, %cst_8 {dimension_numbers = #tpu.dot_dimension_numbers<[1], [0], [0], [1], [0, 0, 1, 1], [], []>} : vector<8x64xf32>, vector<64x48xf32>, vector<8x48xf32> -> vector<8x48xf32>
    %c0_9 = arith.constant 0 : index
    %c0_10 = arith.constant 0 : index
    %10 = vector.load %arg4[%c0_9, %c0_10] : memref<1x48xf32, #tpu.memory_space<vmem>>, vector<1x48xf32>
    %11 = vector.broadcast %10 : vector<1x48xf32> to vector<8x48xf32>
    %12 = arith.addf %9, %11 : vector<8x48xf32>
    %cst_11 = arith.constant 0.000000e+00 : f32
    %13 = vector.broadcast %cst_11 : f32 to vector<8x48xf32>
    %14 = arith.maximumf %12, %13 : vector<8x48xf32>
    %c0_12 = arith.constant 0 : index
    %c0_13 = arith.constant 0 : index
    %15 = vector.load %arg5[%c0_12, %c0_13] : memref<48x16xf32, #tpu.memory_space<vmem>>, vector<48x16xf32>
    %cst_14 = arith.constant dense<0.000000e+00> : vector<8x16xf32>
    %16 = tpu.matmul %14, %15, %cst_14 {dimension_numbers = #tpu.dot_dimension_numbers<[1], [0], [0], [1], [0, 0, 1, 1], [], []>} : vector<8x48xf32>, vector<48x16xf32>, vector<8x16xf32> -> vector<8x16xf32>
    %c0_15 = arith.constant 0 : index
    %c0_16 = arith.constant 0 : index
    %17 = vector.load %arg6[%c0_15, %c0_16] : memref<1x16xf32, #tpu.memory_space<vmem>>, vector<1x16xf32>
    %18 = vector.broadcast %17 : vector<1x16xf32> to vector<8x16xf32>
    %19 = arith.addf %16, %18 : vector<8x16xf32>
    %c0_17 = arith.constant 0 : index
    %c0_18 = arith.constant 0 : index
    %20 = vector.load %arg7[%c0_17, %c0_18] : memref<8x16xf32, #tpu.memory_space<vmem>>, vector<8x16xf32>
    tpu.vector_store %arg7[%c0_17, %c0_18], %19 {strides = array<i32>} : memref<8x16xf32, #tpu.memory_space<vmem>>, vector<8x16xf32>,
    return
  }
}

</mosaic_0001>

<bundles_post_ra>
// kernel: mlp_forward.1
= control target key start
LH: loop header
LB: loop body
LE: loop exit
PB: predicated region body
PF: predicated region fallthrough
CT: control target
= control target key end

     0   :  { %v434_v3 = vmov 0.0|0.0   ;;  %vm435_vm0 = vmmov 0   ;;  %v436_v6 = vmov 0.0   ;;  %s559_s0 = inlined_call_operand.vmem [shape: f32[8,32], index: 0, kind: input, shape index: {}]   ;;  %s560_s1 = inlined_call_operand.vmem [shape: f32[32,64], index: 1, kind: input, shape index: {}]   ;;  %s561_s2 = inlined_call_operand.vmem [shape: f32[1,64], index: 2, kind: input, shape index: {}]   ;;  %s562_s3 = inlined_call_operand.vmem [shape: f32[64,48], index: 3, kind: input, shape index: {}]   ;;  %s563_s4 = inlined_call_operand.vmem [shape: f32[1,48], index: 4, kind: input, shape index: {}]   ;;  %s564_s5 = inlined_call_operand.vmem [shape: f32[48,16], index: 5, kind: input, shape index: {}]   ;;  %s565_s6 = inlined_call_operand.vmem [shape: f32[1,16], index: 6, kind: input, shape index: {}]   ;;  %s566_s7 = inlined_call_operand.hbm [shape: f32[8,16], index: 7, kind: output, shape index: {}]  }
   0x1   :  { %v28_v0 = vld [vmem:[%s560_s1] sm:$0xff]  ;;  %v29_v1 = vld [vmem:[%s560_s1 + $0x8] sm:$0xff]  ;;  %v30_v2 = vld [vmem:[%s560_s1 + $0x10] sm:$0xff]  ;;  %379 = vmatprep.subr.bf16.mxu0 %v434_v3  ;;  %342 = vmatprep.mubr.msk.f32.mxu0 %vm435_vm0, %v436_v6 }
   0x2   :  { %v380_v4 = vpack.c.bf16 %v29_v1, %v28_v0  ;;  %v31_v5 = vld [vmem:[%s560_s1 + $0x18] sm:$0xff]  ;;  %v114_v7 = vld [vmem:[%s562_s3] sm:$0xff]  ;;  %385 = vmatprep.subr.bf16.mxu1 %v434_v3  ;;  %v115_v8 = vld [vmem:[%s562_s3 + $0x8] sm:$0xff]  ;;  %361 = vmatprep.mubr.msk.f32.mxu1 %vm435_vm0, %v436_v6 }
   0x3   :  { %v116_v9 = vld [vmem:[%s562_s3 + $0x10] sm:$0xff]  ;;  %v117_v10 = vld [vmem:[%s562_s3 + $0x18] sm:$0xff]  ;;  %v383_v11 = vpack.c.bf16 %v31_v5, %v30_v2  ;;  %v386_v12 = vpack.c.bf16 %v115_v8, %v114_v7 }
   0x4   :  { %381 = vmatpush3.bf16.msra.mxu0 %v380_v4 }
   0x5   :  { %382 = vmatprep.subr.bf16.mxu0 %v434_v3 }
   0x6   :  { %12 = vsyncpa [#allocation3], 0  ;;  %387 = vmatpush3.bf16.msra.mxu1 %v386_v12  ;;  %v389_v13 = vpack.c.bf16 %v117_v10, %v116_v9  ;;  %v118_v14 = vld [vmem:[%s562_s3 + $0x20] sm:$0xff]  ;;  %v119_v15 = vld [vmem:[%s562_s3 + $0x28] sm:$0xff]  ;;  %vm39_vm1 = vcmask 261120   ;;  %vm129_vm2 = vcmask 523264  }
   0x7   :  { %388 = vmatprep.subr.bf16.mxu1 %v434_v3  ;;  %v27_v16 = vld [vmem:[%s559_s0] sm:$0xff]  ;;  %v392_v17 = vpack.c.bf16 %v119_v15, %v118_v14  ;;  %v120_v18 = vld [vmem:[%s562_s3 + $0x30] sm:$0xff]  ;;  %v121_v19 = vld [vmem:[%s562_s3 + $0x38] sm:$0xff]  ;;  %vm217_vm3 = vcmask 392192   ;;  %s437_s17 = smov [#allocation2]   ;;  %vm291_vm4 = vcmask 130048  }
   0x8   :  { %384 = vmatpush3.bf16.msra.mxu0 %v383_v11  ;;  %v395_v20 = vpack.c.bf16 %v121_v19, %v120_v18  ;;  %v204_v21 = vld [vmem:[%s564_s5] sm:$0xff]  ;;  %v205_v22 = vld [vmem:[%s564_s5 + $0x8] sm:$0xff]  ;;  %v206_v23 = vld [vmem:[%s564_s5 + $0x10] sm:$0xff]  ;;  %s299_s18 = sshll.u32 %s437_s17, 4  ;;  %s300_s18 = int_to_ptr.vmem [resolvable:$true] %s299_s18 }
   0x9   :  { %397 = vmatprep.subr.bf16.mxu0 %v434_v3  ;;  %v398_v24 = vpack.c.bf16 %v205_v22, %v204_v21  ;;  %v207_v25 = vld [vmem:[%s564_s5 + $0x18] sm:$0xff]  ;;  %v307_v27 = vld [vmem:[%s561_s2] ss:$0 sm:$0xff]  ;;  %v209_v33 = vld [vmem:[%s564_s5 + $0x28] sm:$0xff]  ;;  %p415_p1 = scmp.lt.s32.totalorder %s300_s18, %s300_s18 }
   0xa   :  { %390 = vmatpush3.bf16.msra.mxu1 %v389_v13  ;;  %v401_v26 = vpack.c.bf16 %v207_v25, %v206_v23  ;;  %v208_v32 = vld [vmem:[%s564_s5 + $0x20] sm:$0xff]  ;;  %s410_s5 = scalar_lea.vmem %s300_s18, 128 }
   0xb   :  { %343 = vmatmul.mubr.msk.f32.vlgmr.msra.gmra.mrb[0].mxu0 %vm39_vm1, %v27_v16  ;;  %391 = vmatprep.subr.bf16.mxu1 %v434_v3  ;;  %v404_v34 = vpack.c.bf16 %v209_v33, %v208_v32  ;;  %v309_v35 = vld [vmem:[%s563_s4] ss:$0 sm:$0xff]  ;;  %p411_p0 = scmp.ne.s32.totalorder %s300_s18, %s410_s5  ;;  %p416_p2 = scmp.lt.s32.totalorder %s410_s5, %s410_s5 }
   0xc   :  { %376 = vmatprep.mubr.msk.f32.mxu0 %vm435_vm0, %v436_v6  ;;  %399 = vmatpush3.bf16.msra.mxu0 %v398_v24  ;;  %v311_v40 = vld [vmem:[%s565_s6] ss:$0 sm:$0xff] }
   0xd   :  { %400 = vmatprep.subr.bf16.mxu0 %v434_v3  ;;  %p417_p3 = por %p416_p2, %p415_p1 }
   0xe   :  { %393 = vmatpush3.bf16.msra.mxu1 %v392_v17 }
   0xf   :  { %394 = vmatprep.subr.bf16.mxu1 %v434_v3  ;;  %p418_p4 = pnand %p417_p3, %p411_p0 }
  0x10   :  { %402 = vmatpush3.bf16.msra.mxu0 %v401_v26 }
  0x11   :  { %403 = vmatprep.subr.bf16.mxu0 %v434_v3 }
  0x12   :  { %396 = vmatpush3.bf16.msra.mxu1 %v395_v20 }
  0x14   :  { %405 = vmatpush3.bf16.msra.mxu0 %v404_v34 }
  0xde   :  { %v109_v28 = vpop.f32.mrb[0].mxu0 }
  0xdf   :  { %v110_v29 = vadd.f32 %v307_v27, %v109_v28  ;;  %v344_v30 = vpop.f32.mrb[1].mxu0 }
  0xe1   :  { %v113_v31 = vmax.f32 %v110_v29, 0.0 }
  0xe3   :  { %362 = vmatmul.mubr.msk.f32.vlgmr.msra.gmra.mrb[0].mxu1 %vm129_vm2, %v113_v31 }
 0x1b6   :  { %v199_v36 = vpop.f32.mrb[0].mxu1 }
 0x1b7   :  { %v200_v37 = vadd.f32 %v309_v35, %v199_v36  ;;  %v363_v38 = vpop.f32.mrb[1].mxu1 }
 0x1b9   :  { %v203_v39 = vmax.f32 %v200_v37, 0.0 }
 0x1bb   :  { %377 = vmatmul.mubr.msk.f32.vlgmr.msra.gmra.mrb[2].mxu0 %vm217_vm3, %v203_v39 }
 0x28e   :  { %v287_v41 = vpop.f32.mrb[2].mxu0 }
 0x28f   :  { %v288_v42 = vadd.f32 %v311_v40, %v287_v41  ;;  %v378_v43 = vpop.f32.mrb[3].mxu0 }
 0x291   :  { %292 = vst.msk [vmem:[#allocation2] sm:$0xff] %vm291_vm4, %v288_v42 }
 0x292   :  { %421 = shalt.err (!%p418_p4)
}
 0x293   :  { %s422_s20 = scalar_lea.hbm %s566_s7, 128 }
 0x294   :  { %p423_p5 = scmp.ne.s32.totalorder %s566_s7, %s422_s20  ;;  %p426_p6 = scmp.lt.u32.totalorder %s422_s20, %s566_s7 }
 0x296   :  { %p428_p7 = pnand %p426_p6, %p423_p5 }
 0x298   :  { %431 = shalt.err (!%p428_p7)
}
 0x299   :  { %302 = dma.vmem_to_hbm [thread:$0]  %s300_s18, 128, %s566_s7, [#allocation3]  }
 0x29a   :  { %432 = dma.done.wait [#allocation3], 128  }
 0x29b   :  { %433 = vsyncadd [#allocation3], 4294967168 }
 0x29c   :  { %306 = vsyncpa [#allocation3], 1 }

</bundles_post_ra>
